<compile_context>
chip_gen: v6e
topology: v6e:2x2x1
jax: 0.10.0
libtpu: 0.0.40
codegen_flags: <defaults>
</compile_context>

<pallas_src>
import jax
import jax.numpy as jnp
from jax.experimental import pallas as pl
from jax.experimental.pallas import tpu as pltpu


def multiplex_curve_kernel(base_ref, sel_ref, out_ref):
    # base_ref: (B, TL), sel_ref: (B, 1), out_ref: (1, TL)
    sel = jnp.clip(sel_ref[...], 1e-6, 1.0)                     # clamp_(1e-6, 1)
    # VPU broadcast-multiply + sublane reduction (no MXU, no sel.T relayout).
    out_ref[...] = jnp.sum(base_ref[...] * sel, axis=0, keepdims=True)


def _pick_lane_tile(L: int, max_tl: int = 1024) -> int:
    """Largest lane-dense (multiple-of-128) tile <= max_tl that divides L."""
    if L % 128 != 0 or L <= max_tl:
        return L                      # full-extent block is always legal
    tl = max_tl - (max_tl % 128)
    while L % tl != 0:
        tl -= 128
    return max(tl, 128)


def multiplex_curve_lane_dense(spectral_base: jax.Array,
                               select: jax.Array) -> jax.Array:
    """spectral_base: (B, L) f32, select: (B, 1) f32  ->  curve: (1, L) f32."""
    B, L = spectral_base.shape
    tl = _pick_lane_tile(L)
    grid = (pl.cdiv(L, tl),)

    return pl.pallas_call(
        multiplex_curve_kernel,
        out_shape=jax.ShapeDtypeStruct((1, L), jnp.float32),
        grid=grid,
        in_specs=[
            pl.BlockSpec((B, tl), lambda i: (0, i)),   # tile the lane (L) axis
            pl.BlockSpec((B, 1), lambda i: (0, 0)),    # select stays resident
        ],
        out_specs=pl.BlockSpec((1, tl), lambda i: (0, i)),
        compiler_params=pltpu.CompilerParams(
            dimension_semantics=("parallel",)),
    )(spectral_base, select)


def multiplex_curve(spectral_base: jax.Array, select: jax.Array) -> jax.Array:
    """Drop-in PyTorch-shaped output: (L, 1) column vector."""
    out_1L = multiplex_curve_lane_dense(spectral_base, select)
    return out_1L.reshape(spectral_base.shape[1], 1)


if __name__ == "__main__":
    key = jax.random.PRNGKey(0)
    kb, ks = jax.random.split(key)

    # Small shapes consistent with the module: 8 spectral bases of length 128.
    B, L = 8, 128
    spectral_base = jax.random.normal(kb, (B, L), dtype=jnp.float32)
    select = jax.random.uniform(ks, (B, 1), dtype=jnp.float32)

    curve_lane = multiplex_curve_lane_dense(spectral_base, select)   # (1, L)
    curve_col = multiplex_curve(spectral_base, select)               # (L, 1)
    jax.block_until_ready(curve_lane)
    jax.block_until_ready(curve_col)

    # Pure-JAX reference of the PyTorch forward.
    sel_ref = jnp.clip(select, 1e-6, 1.0)
    curve_ref = spectral_base.T @ sel_ref                            # (L, 1)
    assert curve_lane.shape == (1, L)
    assert curve_col.shape == (L, 1)
    assert jnp.allclose(curve_lane[0], curve_ref[:, 0], atol=1e-5, rtol=1e-5)
    assert jnp.allclose(curve_col, curve_ref, atol=1e-5, rtol=1e-5)

    # Exercise the tiled (multi-grid-step) path with a longer curve.
    B2, L2 = 8, 4096
    kb2, ks2 = jax.random.split(jax.random.PRNGKey(1))
    base2 = jax.random.normal(kb2, (B2, L2), dtype=jnp.float32)
    sel2 = jax.random.uniform(ks2, (B2, 1), dtype=jnp.float32)
    out2 = multiplex_curve_lane_dense(base2, sel2)
    jax.block_until_ready(out2)
    ref2 = (base2.T @ jnp.clip(sel2, 1e-6, 1.0))[:, 0]
    assert jnp.allclose(out2[0], ref2, atol=1e-4, rtol=1e-5)

    print("KERNEL_OK")
</pallas_src>

<mosaic_0001>
module attributes {stable_mosaic.version = 11 : i64} {
  func.func @multiplex_curve_kernel(%arg0: i32, %arg1: memref<8x128xf32, #tpu.memory_space<vmem>>, %arg2: memref<8x1xf32, #tpu.memory_space<vmem>>, %arg3: memref<1x128xf32, #tpu.memory_space<vmem>>) attributes {dimension_semantics = [#tpu.dimension_semantics<parallel>], iteration_bounds = array<i64: 1>, scalar_prefetch = 0 : i64, scratch_operands = 0 : i64, tpu.core_type = #tpu.core_type<tc>, window_params = [{transform_indices = @transform_0, window_bounds = array<i64: 8, 128>}, {pipeline_mode = #tpu.pipeline_mode<synchronous>, transform_indices = @transform_1, window_bounds = array<i64: 8, 1>}, {transform_indices = @transform_2, window_bounds = array<i64: 1, 128>}]} {
    %c0 = arith.constant 0 : index
    %c0_0 = arith.constant 0 : index
    %0 = vector.load %arg2[%c0, %c0_0] : memref<8x1xf32, #tpu.memory_space<vmem>>, vector<8x1xf32>
    %cst = arith.constant 9.99999997E-7 : f32
    %cst_1 = arith.constant 1.000000e+00 : f32
    %1 = vector.broadcast %cst : f32 to vector<8x1xf32>
    %2 = arith.maximumf %1, %0 : vector<8x1xf32>
    %3 = vector.broadcast %cst_1 : f32 to vector<8x1xf32>
    %4 = arith.minimumf %3, %2 : vector<8x1xf32>
    %c0_2 = arith.constant 0 : index
    %c0_3 = arith.constant 0 : index
    %5 = vector.load %arg1[%c0_2, %c0_3] : memref<8x128xf32, #tpu.memory_space<vmem>>, vector<8x128xf32>
    %6 = vector.broadcast %4 : vector<8x1xf32> to vector<8x128xf32>
    %7 = arith.mulf %5, %6 : vector<8x128xf32>
    %cst_4 = arith.constant dense<0.000000e+00> : vector<128xf32>
    %8 = vector.multi_reduction <add>, %7, %cst_4 [0] : vector<8x128xf32> to vector<128xf32>
    %9 = vector.shape_cast %8 : vector<128xf32> to vector<1x128xf32>
    %c0_5 = arith.constant 0 : index
    %c0_6 = arith.constant 0 : index
    %10 = vector.load %arg3[%c0_5, %c0_6] : memref<1x128xf32, #tpu.memory_space<vmem>>, vector<1x128xf32>
    tpu.vector_store %arg3[%c0_5, %c0_6], %9 {strides = array<i32>} : memref<1x128xf32, #tpu.memory_space<vmem>>, vector<1x128xf32>,
    return
  }
  func.func @transform_0(%arg0: i32) -> (i32, i32) {
    %c0_i32 = arith.constant 0 : i32
    %c0_i32_0 = arith.constant 0 : i32
    return %c0_i32, %arg0 : i32, i32
  }
  func.func @transform_1(%arg0: i32) -> (i32, i32) {
    %c0_i32 = arith.constant 0 : i32
    %c0_i32_0 = arith.constant 0 : i32
    %c0_i32_1 = arith.constant 0 : i32
    return %c0_i32, %c0_i32_0 : i32, i32
  }
  func.func @transform_2(%arg0: i32) -> (i32, i32) {
    %c0_i32 = arith.constant 0 : i32
    %c0_i32_0 = arith.constant 0 : i32
    return %c0_i32, %arg0 : i32, i32
  }
}

</mosaic_0001>

<bundles_post_ra>
// kernel: tpu_custom_call.1
= control target key start
LH: loop header
LB: loop body
LE: loop exit
PB: predicated region body
PF: predicated region fallthrough
CT: control target
= control target key end

     0   :  { %s94_s0 = inlined_call_operand.vmem [shape: f32[8,128], index: 0, kind: input, shape index: {}]   ;;  %s95_s1 = inlined_call_operand.vmem [shape: f32[8,1], index: 1, kind: input, shape index: {}]   ;;  %s96_s2 = inlined_call_operand.hbm [shape: f32[1,128], index: 2, kind: output, shape index: {}]  }
   0x1   :  { %v12_v0 = vld [vmem:[%s95_s1] sm:$0xff] }
   0x2   :  { %7 = vsyncpa [#allocation3], 0  ;;  %v68_v1 = vmov 0   ;;  %v13_v2 = vmax.f32 %v12_v0, 1e-06  ;;  %v15_v4 = vld [vmem:[%s94_s0] sm:$0xff] }
   0x3   :  { %45 = vset.pattern.permute.xlu0 %v68_v1  ;;  %s69_s13 = smov [#allocation2]  }
   0x4   :  { %v14_v3 = vmin.f32 %v13_v2, 1.0  ;;  %s35_s14 = sshll.u32 %s69_s13, 4  ;;  %s36_s14 = int_to_ptr.vmem [resolvable:$true] %s35_s14 }
   0x5   :  { %s46_s1 = scalar_lea.vmem %s36_s14, 16  ;;  %s50_s15 = scalar_lea.vmem %s36_s14, 32 }
   0x6   :  { %18 = vperm.xlu0 %45, %v14_v3   ;;  %p47_p0 = scmp.ne.s32.totalorder %s36_s14, %s46_s1  ;;  %p51_p1 = scmp.lt.s32.totalorder %s36_s14, %s36_s14 }
   0x7   :  { %p52_p2 = scmp.lt.s32.totalorder %s50_s15, %s46_s1 }
   0x9   :  { %p53_p3 = por %p52_p2, %p51_p1 }
   0xb   :  { %p54_p4 = pnand %p53_p3, %p47_p0 }
  0x81   :  { %v19_v5 = vpop.permute.xlu0 %18 }
  0x82   :  { %v21_v6 = vmul.f32 %v19_v5, %v15_v4 }
  0x84   :  { %v22_v7 = vrot.slane %v21_v6, 4 }
  0x86   :  { %v23_v8 = vadd.f32 %v22_v7, %v21_v6 }
  0x88   :  { %v24_v9 = vrot.slane %v23_v8, 2 }
  0x8a   :  { %v25_v10 = vadd.f32 %v24_v9, %v23_v8 }
  0x8c   :  { %v26_v11 = vrot.slane %v25_v10, 1 }
  0x8e   :  { %v27_v12 = vadd.f32 %v26_v11, %v25_v10 }
  0x90   :  { %28 = vst [vmem:[#allocation2] sm:$0x1] %v27_v12 }
  0x91   :  { %57 = shalt.err (!%p54_p4)
}
  0x92   :  { %38 = dma.vmem_to_hbm [thread:$0]  %s36_s14, 16, %s96_s2, [#allocation3]  }
  0x93   :  { %66 = dma.done.wait [#allocation3], 16  }
  0x94   :  { %67 = vsyncadd [#allocation3], 4294967280 }
  0x95   :  { %42 = vsyncpa [#allocation3], 1 }

</bundles_post_ra>
